<compile_context>
chip_gen: v6e
topology: v6e:2x2x1
jax: 0.10.0
libtpu: 0.0.40
codegen_flags: <defaults>
</compile_context>

<pallas_src>
import functools

import jax
import jax.numpy as jnp
from jax.experimental import pallas as pl
from jax.experimental.pallas import tpu as pltpu


def _round_up(x, m):
    return ((x + m - 1) // m) * m


def _probe_kernel(x_ref, w1_ref, b1_ref, w2_ref, b2_ref, o_ref):
    """Fused MLP probe tile: ReLU(x @ W1 + b1) @ W2 + b2.

    Weights/biases are fully VMEM-resident (hidden dim lane-padded to 128); features and
    output are tiled over the batch.  Both matmuls hit the MXU with f32 accumulation; the
    hidden activation stays f32.  Bias add + ReLU run on the VPU.
    """
    x = x_ref[...]                                                    # (TB, d_in)
    h = jnp.dot(x, w1_ref[...], preferred_element_type=jnp.float32)   # (TB, H_pad) f32
    h = jnp.maximum(h + b1_ref[...], 0.0)                             # bias + ReLU
    y = jnp.dot(h, w2_ref[...], preferred_element_type=jnp.float32)   # (TB, F) f32
    o_ref[...] = (y + b2_ref[...]).astype(o_ref.dtype)


def prepare_probe_params(w1, b1, w2, b2):
    """One-time weight staging (outside the per-call path).

    Only the hidden dim H is zero-padded to a 128-lane multiple (costs a few KiB of
    weight padding, keeps the intermediate activation lane-dense).  The output dim F is
    left UNPADDED — padding it was pure extra HBM writeback.  Zero padding is exact:
    ReLU(0 + 0) = 0 in the padded hidden columns and the padded W2 rows are 0.
    """
    w1 = jnp.asarray(w1, jnp.float32)
    b1 = jnp.asarray(b1, jnp.float32).reshape(1, -1)
    w2 = jnp.asarray(w2, jnp.float32)
    b2 = jnp.asarray(b2, jnp.float32).reshape(1, -1)
    H = w1.shape[1]
    H_pad = _round_up(H, 128)
    if H_pad != H:
        w1 = jnp.pad(w1, ((0, 0), (0, H_pad - H)))
        b1 = jnp.pad(b1, ((0, 0), (0, H_pad - H)))
        w2 = jnp.pad(w2, ((0, H_pad - H), (0, 0)))
    return w1, b1, w2, b2


@functools.partial(jax.jit, static_argnames=("block_b",))
def probe_forward_pallas(features, w1_p, b1_p, w2_p, b2_p, *, block_b=None):
    """Run the probe MLP on encoded features via a Pallas TPU kernel.

    features : (B, input_dim)              (any float dtype; no wrapper-side cast)
    w1_p     : (input_dim, H_pad)          (from prepare_probe_params)
    b1_p     : (1, H_pad)
    w2_p     : (H_pad, num_factors)
    b2_p     : (1, num_factors)
    returns  : (B, num_factors) f32
    """
    features = jnp.asarray(features)
    B, d_in = features.shape
    H_pad = w1_p.shape[1]
    F = w2_p.shape[1]

    # ---- batch tile selection -------------------------------------------------
    #  * multiple of 8 (sublane); default large (2048 rows) so each grid step moves
    #    >= ~1-2 MB and the ~0.35 us/step overhead is amortized,
    #  * capped so the grid has >= 2 steps when B > 8 (keeps both v7x TensorCores
    #    busy via the "parallel" axis; harmless one extra step on v5e/v6e),
    #  * shrunk as a backstop to a conservative VMEM budget for large latent dims.
    tb = 2048 if block_b is None else int(block_b)
    tb = min(tb, _round_up(B, 8))                        # never bigger than the batch
    tb = min(tb, max(8, _round_up(pl.cdiv(B, 2), 8)))    # >= 2 grid steps when possible
    tb = max(8, _round_up(tb, 8))

    x_bytes = features.dtype.itemsize
    w_bytes = w1_p.dtype.itemsize

    def vmem_bytes(tb_):
        feats = 2 * tb_ * d_in * x_bytes                 # double-buffered input tiles
        outs = 2 * tb_ * F * 4                           # double-buffered output tiles
        wts = (d_in * H_pad + H_pad * F) * w_bytes + (H_pad + F) * 4
        interm = 2 * tb_ * H_pad * 4                     # f32 hidden activation + slack
        return feats + outs + wts + interm

    VMEM_BUDGET = 24 * 1024 * 1024                       # fits every generation
    while tb > 8 and vmem_bytes(tb) > VMEM_BUDGET:
        tb = max(8, _round_up(tb // 2, 8))

    # Ragged last block when B % tb != 0: OOB rows compute garbage but their stores are
    # masked by Pallas (row-wise MLP => no contamination of valid rows). No batch padding.
    grid = (pl.cdiv(B, tb),)

    flops = 2 * B * (d_in * H_pad + H_pad * F)
    bytes_accessed = (B * d_in * x_bytes                               # feature stream
                      + (d_in * H_pad + H_pad * F) * w_bytes
                      + (H_pad + F) * 4
                      + B * F * 4)                                     # output writeback

    return pl.pallas_call(
        _probe_kernel,
        out_shape=jax.ShapeDtypeStruct((B, F), jnp.float32),
        grid_spec=pl.GridSpec(
            grid=grid,
            in_specs=[
                pl.BlockSpec((tb, d_in), lambda i: (i, 0)),      # features: tiled over batch
                pl.BlockSpec((d_in, H_pad), lambda i: (0, 0)),   # W1: resident
                pl.BlockSpec((1, H_pad), lambda i: (0, 0)),      # b1
                pl.BlockSpec((H_pad, F), lambda i: (0, 0)),      # W2 (F unpadded)
                pl.BlockSpec((1, F), lambda i: (0, 0)),          # b2
            ],
            out_specs=pl.BlockSpec((tb, F), lambda i: (i, 0)),   # lane-narrow but tiny
        ),
        compiler_params=pltpu.CompilerParams(
            dimension_semantics=("parallel",),                   # megacore sharding on v7x
            vmem_limit_bytes=32 * 1024 * 1024,                   # v5e default (~16 MiB) too low
        ),
        cost_estimate=pl.CostEstimate(
            flops=flops, transcendentals=0, bytes_accessed=bytes_accessed),
    )(features, w1_p, b1_p, w2_p, b2_p)


def probe_reference(features, w1, b1, w2, b2):
    """Pure-JAX reference (also the better choice for tiny batches)."""
    h = jnp.maximum(features @ w1 + b1.reshape(1, -1), 0.0)
    return h @ w2 + b2.reshape(1, -1)


def probe_forward(features, w1, b1, w2, b2, *, min_pallas_batch=1024, **kwargs):
    """Auto-dispatch: tiny batches go to plain jnp (a kernel launch is pure overhead)."""
    if features.shape[0] < min_pallas_batch:
        return probe_reference(features, w1, b1, w2, b2)
    params = prepare_probe_params(w1, b1, w2, b2)
    return probe_forward_pallas(features, *params, **kwargs)


def init_probe_params(key, input_dim, num_factors, multiplier=16):
    """Deterministic init matching nn.Linear's U(-1/sqrt(fan_in), 1/sqrt(fan_in))."""
    hidden_dim = multiplier * num_factors
    k1, k2, k3, k4 = jax.random.split(key, 4)
    lim1 = 1.0 / jnp.sqrt(jnp.float32(input_dim))
    lim2 = 1.0 / jnp.sqrt(jnp.float32(hidden_dim))
    w1 = jax.random.uniform(k1, (input_dim, hidden_dim), jnp.float32, -lim1, lim1)
    b1 = jax.random.uniform(k2, (1, hidden_dim), jnp.float32, -lim1, lim1)
    w2 = jax.random.uniform(k3, (hidden_dim, num_factors), jnp.float32, -lim2, lim2)
    b2 = jax.random.uniform(k4, (1, num_factors), jnp.float32, -lim2, lim2)
    return w1, b1, w2, b2


if __name__ == "__main__":
    # Module-implied toy shapes: batch=8, model.latent_dim=32, num_factors=4,
    # multiplier=16 -> hidden_dim=64.
    B, LATENT_DIM, NUM_FACTORS, MULTIPLIER = 8, 32, 4, 16

    key = jax.random.PRNGKey(0)
    k_x, k_p, k_x2 = jax.random.split(key, 3)

    # model.encode(x) treated as identity -> features of shape (B, latent_dim)
    features = jax.random.normal(k_x, (B, LATENT_DIM), jnp.float32)
    w1, b1, w2, b2 = init_probe_params(k_p, LATENT_DIM, NUM_FACTORS, MULTIPLIER)

    # Weight staging (hidden-dim lane padding) done once, outside the per-call path.
    params = prepare_probe_params(w1, b1, w2, b2)

    # 1) exercise the Pallas kernel at the module's toy shapes (f32, exact check)
    pred = jax.block_until_ready(probe_forward_pallas(features, *params))
    ref = probe_reference(features, w1, b1, w2, b2)
    assert pred.shape == (B, NUM_FACTORS)
    assert jnp.allclose(pred, ref, atol=1e-5, rtol=1e-5)

    # 2) multi-tile path with a ragged last block (1000 % 256 != 0): no batch padding,
    #    OOB stores masked by Pallas.
    B2 = 1000
    features2 = jax.random.normal(k_x2, (B2, LATENT_DIM), jnp.float32)
    pred2 = jax.block_until_ready(
        probe_forward_pallas(features2, *params, block_b=256))
    ref2 = probe_reference(features2, w1, b1, w2, b2)
    assert pred2.shape == (B2, NUM_FACTORS)
    assert jnp.allclose(pred2, ref2, atol=1e-4, rtol=1e-4)

    # 3) default (auto-sized) tile on the same batch; grid kept >= 2 steps for v7x.
    pred3 = jax.block_until_ready(probe_forward_pallas(features2, *params))
    assert jnp.allclose(pred3, ref2, atol=1e-4, rtol=1e-4)

    print("KERNEL_OK")
</pallas_src>

<mosaic_0001>
module attributes {stable_mosaic.version = 11 : i64} {
  func.func @_probe_kernel(%arg0: i32, %arg1: memref<8x32xf32, #tpu.memory_space<vmem>>, %arg2: memref<32x128xf32, #tpu.memory_space<vmem>>, %arg3: memref<1x128xf32, #tpu.memory_space<vmem>>, %arg4: memref<128x4xf32, #tpu.memory_space<vmem>>, %arg5: memref<1x4xf32, #tpu.memory_space<vmem>>, %arg6: memref<8x4xf32, #tpu.memory_space<vmem>>) attributes {dimension_semantics = [#tpu.dimension_semantics<parallel>], iteration_bounds = array<i64: 1>, scalar_prefetch = 0 : i64, scratch_operands = 0 : i64, tpu.core_type = #tpu.core_type<tc>, window_params = [{transform_indices = @transform_0, window_bounds = array<i64: 8, 32>}, {pipeline_mode = #tpu.pipeline_mode<synchronous>, transform_indices = @transform_1, window_bounds = array<i64: 32, 128>}, {pipeline_mode = #tpu.pipeline_mode<synchronous>, transform_indices = @transform_2, window_bounds = array<i64: 1, 128>}, {pipeline_mode = #tpu.pipeline_mode<synchronous>, transform_indices = @transform_3, window_bounds = array<i64: 128, 4>}, {pipeline_mode = #tpu.pipeline_mode<synchronous>, transform_indices = @transform_4, window_bounds = array<i64: 1, 4>}, {transform_indices = @transform_5, window_bounds = array<i64: 8, 4>}]} {
    %c0 = arith.constant 0 : index
    %c0_0 = arith.constant 0 : index
    %0 = vector.load %arg1[%c0, %c0_0] : memref<8x32xf32, #tpu.memory_space<vmem>>, vector<8x32xf32>
    %c0_1 = arith.constant 0 : index
    %c0_2 = arith.constant 0 : index
    %1 = vector.load %arg2[%c0_1, %c0_2] : memref<32x128xf32, #tpu.memory_space<vmem>>, vector<32x128xf32>
    %cst = arith.constant dense<0.000000e+00> : vector<8x128xf32>
    %2 = tpu.matmul %0, %1, %cst {dimension_numbers = #tpu.dot_dimension_numbers<[1], [0], [0], [1], [0, 0, 1, 1], [], []>} : vector<8x32xf32>, vector<32x128xf32>, vector<8x128xf32> -> vector<8x128xf32>
    %c0_3 = arith.constant 0 : index
    %c0_4 = arith.constant 0 : index
    %3 = vector.load %arg3[%c0_3, %c0_4] : memref<1x128xf32, #tpu.memory_space<vmem>>, vector<1x128xf32>
    %4 = vector.broadcast %3 : vector<1x128xf32> to vector<8x128xf32>
    %5 = arith.addf %2, %4 : vector<8x128xf32>
    %cst_5 = arith.constant 0.000000e+00 : f32
    %6 = vector.broadcast %cst_5 : f32 to vector<8x128xf32>
    %7 = arith.maximumf %5, %6 : vector<8x128xf32>
    %c0_6 = arith.constant 0 : index
    %c0_7 = arith.constant 0 : index
    %8 = vector.load %arg4[%c0_6, %c0_7] : memref<128x4xf32, #tpu.memory_space<vmem>>, vector<128x4xf32>
    %cst_8 = arith.constant dense<0.000000e+00> : vector<8x4xf32>
    %9 = tpu.matmul %7, %8, %cst_8 {dimension_numbers = #tpu.dot_dimension_numbers<[1], [0], [0], [1], [0, 0, 1, 1], [], []>} : vector<8x128xf32>, vector<128x4xf32>, vector<8x4xf32> -> vector<8x4xf32>
    %c0_9 = arith.constant 0 : index
    %c0_10 = arith.constant 0 : index
    %10 = vector.load %arg5[%c0_9, %c0_10] : memref<1x4xf32, #tpu.memory_space<vmem>>, vector<1x4xf32>
    %11 = vector.broadcast %10 : vector<1x4xf32> to vector<8x4xf32>
    %12 = arith.addf %9, %11 : vector<8x4xf32>
    %c0_11 = arith.constant 0 : index
    %c0_12 = arith.constant 0 : index
    %13 = vector.load %arg6[%c0_11, %c0_12] : memref<8x4xf32, #tpu.memory_space<vmem>>, vector<8x4xf32>
    tpu.vector_store %arg6[%c0_11, %c0_12], %12 {strides = array<i32>} : memref<8x4xf32, #tpu.memory_space<vmem>>, vector<8x4xf32>,
    return
  }
  func.func @transform_0(%arg0: i32) -> (i32, i32) {
    %c0_i32 = arith.constant 0 : i32
    %c0_i32_0 = arith.constant 0 : i32
    return %arg0, %c0_i32 : i32, i32
  }
  func.func @transform_1(%arg0: i32) -> (i32, i32) {
    %c0_i32 = arith.constant 0 : i32
    %c0_i32_0 = arith.constant 0 : i32
    %c0_i32_1 = arith.constant 0 : i32
    return %c0_i32, %c0_i32_0 : i32, i32
  }
  func.func @transform_2(%arg0: i32) -> (i32, i32) {
    %c0_i32 = arith.constant 0 : i32
    %c0_i32_0 = arith.constant 0 : i32
    %c0_i32_1 = arith.constant 0 : i32
    return %c0_i32, %c0_i32_0 : i32, i32
  }
  func.func @transform_3(%arg0: i32) -> (i32, i32) {
    %c0_i32 = arith.constant 0 : i32
    %c0_i32_0 = arith.constant 0 : i32
    %c0_i32_1 = arith.constant 0 : i32
    return %c0_i32, %c0_i32_0 : i32, i32
  }
  func.func @transform_4(%arg0: i32) -> (i32, i32) {
    %c0_i32 = arith.constant 0 : i32
    %c0_i32_0 = arith.constant 0 : i32
    %c0_i32_1 = arith.constant 0 : i32
    return %c0_i32, %c0_i32_0 : i32, i32
  }
  func.func @transform_5(%arg0: i32) -> (i32, i32) {
    %c0_i32 = arith.constant 0 : i32
    %c0_i32_0 = arith.constant 0 : i32
    return %arg0, %c0_i32 : i32, i32
  }
}

</mosaic_0001>

<bundles_post_ra>
// kernel: probe_forward_pallas.1
= control target key start
LH: loop header
LB: loop body
LE: loop exit
PB: predicated region body
PF: predicated region fallthrough
CT: control target
= control target key end

     0   :  { %v279_v0 = vmov 0.0   ;;  %vm280_vm0 = vmmov 0   ;;  %vm32_vm1 = vcmask 261120   ;;  %vm200_vm2 = vcmask 31744   ;;  %s407_s1 = inlined_call_operand.vmem [shape: f32[32,128], index: 1, kind: input, shape index: {}]   ;;  %s408_s3 = inlined_call_operand.vmem [shape: f32[128,4], index: 3, kind: input, shape index: {}]   ;;  %s409_s0 = inlined_call_operand.vmem [shape: f32[8,32], index: 0, kind: input, shape index: {}]   ;;  %s410_s2 = inlined_call_operand.vmem [shape: f32[1,128], index: 2, kind: input, shape index: {}]   ;;  %s411_s4 = inlined_call_operand.vmem [shape: f32[1,4], index: 4, kind: input, shape index: {}]   ;;  %s412_s5 = inlined_call_operand.vmem [shape: f32[8,4], index: 5, kind: output, shape index: {}]  }
   0x1   :  { %231 = vmatprep.subr.mxu0 %v279_v0  ;;  %v24_v1 = vld [vmem:[%s407_s1 + $0x18] sm:$0xff]  ;;  %v23_v2 = vld [vmem:[%s407_s1 + $0x10] sm:$0xff]  ;;  %239 = vmatprep.mubr.msk.f32.mxu0 %vm280_vm0, %v279_v0  ;;  %v22_v4 = vld [vmem:[%s407_s1 + $0x8] sm:$0xff] }
   0x2   :  { %232 = vmatpush3.msra.mxu0 %v24_v1  ;;  %242 = vmatprep.subr.mxu1 %v279_v0  ;;  %v122_v3 = vld [vmem:[%s408_s3 + $0x78] sm:$0xff]  ;;  %v121_v5 = vld [vmem:[%s408_s3 + $0x70] sm:$0xff]  ;;  %v120_v6 = vld [vmem:[%s408_s3 + $0x68] sm:$0xff] }
   0x3   :  { %233 = vmatprep.subr.mxu0 %v279_v0  ;;  %243 = vmatpush3.msra.mxu1 %v122_v3  ;;  %v21_v7 = vld [vmem:[%s407_s1] sm:$0xff]  ;;  %v118_v10 = vld [vmem:[%s408_s3 + $0x58] sm:$0xff]  ;;  %v117_v11 = vld [vmem:[%s408_s3 + $0x50] sm:$0xff] }
   0x4   :  { %234 = vmatpush3.msra.mxu0 %v23_v2  ;;  %244 = vmatprep.subr.mxu1 %v279_v0  ;;  %v20_v8 = vld [vmem:[%s409_s0] sm:$0xff]  ;;  %v116_v12 = vld [vmem:[%s408_s3 + $0x48] sm:$0xff]  ;;  %v114_v14 = vld [vmem:[%s408_s3 + $0x38] sm:$0xff] }
   0x5   :  { %235 = vmatprep.subr.mxu0 %v279_v0  ;;  %245 = vmatpush3.msra.mxu1 %v121_v5  ;;  %v119_v9 = vld [vmem:[%s408_s3 + $0x60] sm:$0xff]  ;;  %v113_v15 = vld [vmem:[%s408_s3 + $0x30] sm:$0xff]  ;;  %v112_v16 = vld [vmem:[%s408_s3 + $0x28] sm:$0xff] }
   0x6   :  { %236 = vmatpush3.msra.mxu0 %v22_v4  ;;  %246 = vmatprep.subr.mxu1 %v279_v0  ;;  %v115_v13 = vld [vmem:[%s408_s3 + $0x40] sm:$0xff]  ;;  %v110_v18 = vld [vmem:[%s408_s3 + $0x18] sm:$0xff]  ;;  %v109_v19 = vld [vmem:[%s408_s3 + $0x10] sm:$0xff] }
   0x7   :  { %237 = vmatprep.subr.mxu0 %v279_v0  ;;  %247 = vmatpush3.msra.mxu1 %v120_v6  ;;  %v111_v17 = vld [vmem:[%s408_s3 + $0x20] sm:$0xff]  ;;  %v108_v20 = vld [vmem:[%s408_s3 + $0x8] sm:$0xff] }
   0x8   :  { %238 = vmatpush3.msra.mxu0 %v21_v7  ;;  %248 = vmatprep.subr.mxu1 %v279_v0  ;;  %v107_v21 = vld [vmem:[%s408_s3] sm:$0xff] }
   0x9   :  { %240 = vmatmul.mubr.msk.f32.vlgmr.msra.gmra.mxu0 %vm32_vm1, %v20_v8  ;;  %249 = vmatpush3.msra.mxu1 %v119_v9  ;;  %v206_v22 = vld [vmem:[%s410_s2] ss:$0 sm:$0xff] }
   0xa   :  { %250 = vmatprep.subr.mxu1 %v279_v0  ;;  %274 = vmatprep.mubr.msk.f32.mxu1 %vm280_vm0, %v279_v0  ;;  %v208_v27 = vld [vmem:[%s411_s4] ss:$0 sm:$0xff] }
   0xb   :  { %251 = vmatpush3.msra.mxu1 %v118_v10 }
   0xc   :  { %252 = vmatprep.subr.mxu1 %v279_v0 }
   0xd   :  { %253 = vmatpush3.msra.mxu1 %v117_v11 }
   0xe   :  { %254 = vmatprep.subr.mxu1 %v279_v0 }
   0xf   :  { %255 = vmatpush3.msra.mxu1 %v116_v12 }
  0x10   :  { %256 = vmatprep.subr.mxu1 %v279_v0 }
  0x11   :  { %257 = vmatpush3.msra.mxu1 %v115_v13 }
  0x12   :  { %258 = vmatprep.subr.mxu1 %v279_v0 }
  0x13   :  { %259 = vmatpush3.msra.mxu1 %v114_v14 }
  0x14   :  { %260 = vmatprep.subr.mxu1 %v279_v0 }
  0x15   :  { %261 = vmatpush3.msra.mxu1 %v113_v15 }
  0x16   :  { %262 = vmatprep.subr.mxu1 %v279_v0 }
  0x17   :  { %263 = vmatpush3.msra.mxu1 %v112_v16 }
  0x18   :  { %264 = vmatprep.subr.mxu1 %v279_v0 }
  0x19   :  { %265 = vmatpush3.msra.mxu1 %v111_v17 }
  0x1a   :  { %266 = vmatprep.subr.mxu1 %v279_v0 }
  0x1b   :  { %267 = vmatpush3.msra.mxu1 %v110_v18 }
  0x1c   :  { %268 = vmatprep.subr.mxu1 %v279_v0 }
  0x1d   :  { %269 = vmatpush3.msra.mxu1 %v109_v19 }
  0x1e   :  { %270 = vmatprep.subr.mxu1 %v279_v0 }
  0x1f   :  { %271 = vmatpush3.msra.mxu1 %v108_v20 }
  0x20   :  { %272 = vmatprep.subr.mxu1 %v279_v0 }
  0x21   :  { %273 = vmatpush3.msra.mxu1 %v107_v21 }
  0xc9   :  { %v102_v23 = vpop.f32.mrf.mxu0 }
  0xca   :  { %v103_v24 = vadd.f32 %v206_v22, %v102_v23 }
  0xcb   :  { %v241_v25 = vpop.f32.mrf.mxu0 }
  0xcc   :  { %v106_v26 = vmax.f32 %v103_v24, 0.0 }
  0xce   :  { %275 = vmatmul.mubr.f32.vlgmr.msra.gmra.mxu1 %v106_v26 }
 0x18e   :  { %v196_v28 = vpop.f32.mrf.mxu1 }
 0x18f   :  { %v197_v29 = vadd.f32 %v208_v27, %v196_v28 }
 0x190   :  { %v276_v30 = vpop.f32.mrf.mxu1 }
 0x191   :  { %201 = vst.msk [vmem:[%s412_s5] sm:$0xff] %vm200_vm2, %v197_v29 }

</bundles_post_ra>
